<compile_context>
chip_gen: v7x
topology: tpu7x:2x2x1
jax: 0.10.0
libtpu: 0.0.40
codegen_flags: <defaults>
</compile_context>

<pallas_src>
import jax
import jax.numpy as jnp
from jax import lax
from jax.experimental import pallas as pl
from jax.experimental.pallas import tpu as pltpu


def _round_up(a, b):
    return ((a + b - 1) // b) * b


def _make_focal_kernel(TM, C, K, M2, nbi, gamma):
    def kernel(logits_ref, tgt_ref, out_ref, acc_ref):
        p = pl.program_id(0)          # parallel (megacore) part
        i = pl.program_id(1)          # sequential row-block within the part

        @pl.when(i == 0)
        def _():
            acc_ref[...] = jnp.zeros_like(acc_ref)

        x = logits_ref[...].astype(jnp.float32)                 # (TM, C)
        # row-wise log_softmax pieces over the class dim
        m = jnp.max(x, axis=-1, keepdims=True)
        lse = jnp.log(jnp.sum(jnp.exp(x - m), axis=-1, keepdims=True))
        logz = m + lse                                          # (TM, 1)

        tgt = tgt_ref[...]                                      # (TM, K) int32

        # Logical (unclamped) row-block index; rows past M2 are masked out, so
        # clamped / padded tail reads contribute exactly zero (NaN-safe via where).
        lb = p * nbi + i
        row_ids = lb * TM + lax.broadcasted_iota(jnp.int32, (TM, 1), 0)
        row_valid = row_ids < M2                                # (TM, 1)

        # Gather logits at the target class: unrolled one-hot select-add over C
        # (pure VPU work; C is a small compile-time constant here).
        gx = jnp.zeros((TM, K), jnp.float32)
        for c in range(C):
            gx = gx + jnp.where(tgt == c, x[:, c:c + 1], 0.0)
        logpt = gx - logz                                       # (TM, K)

        pt = jnp.exp(logpt)
        w = 1.0 - pt
        if float(gamma) == 2.0:
            focal_w = w * w
        else:
            focal_w = jnp.maximum(w, 0.0) ** gamma
        loss = -focal_w * logpt                                 # (TM, K)

        acc_ref[...] += jnp.where(row_valid, loss, 0.0)

        @pl.when(i == pl.num_programs(1) - 1)
        def _():
            part_sum = jnp.sum(acc_ref[...])                    # once per part
            out_ref[...] = jnp.full(out_ref.shape, part_sum, dtype=jnp.float32)

    return kernel


def focal_loss_pallas(inputs, targets, gamma=2.0, reduce=True):
    """Focal loss matching the PyTorch module's forward (reduce=True path)."""
    if not reduce:
        # TODO(synk): reduce=False (per-element loss vector output) not implemented.
        raise NotImplementedError("Only reduce=True is implemented.")

    C = inputs.shape[1]
    logits2d = jnp.reshape(inputs, (-1, C))                     # (N*H*W, C), no copy
    K = targets.shape[1]
    tgt2d = jnp.reshape(targets, (-1, K)).astype(jnp.int32)     # (N*W, K)
    M2 = tgt2d.shape[0]
    total_count = M2 * K

    # Row tile: as large as a conservative VMEM budget allows (double-buffered
    # logits + targets blocks plus the (TM, K) accumulator), capped at 1024 and
    # at the (8-aligned) number of gathered rows.  Stays inside the default
    # scoped-VMEM limit on v5e/v6e/v7x.
    in_bytes = jnp.dtype(inputs.dtype).itemsize
    budget_bytes = 6 * 1024 * 1024
    per_row_bytes = 2 * C * in_bytes + 2 * K * 4 + K * 4
    TM = min(1024, budget_bytes // per_row_bytes, _round_up(M2, 8))
    TM = max(8, (TM // 8) * 8)

    nblocks = pl.cdiv(M2, TM)
    P = 2                               # row split across v7x's 2 TensorCores
    nbi = pl.cdiv(nblocks, P)

    def in_row_map(p, i):
        # Clamp so duplicated / tail blocks never index past the arrays; their
        # contribution is zeroed by the in-kernel row mask.
        return (jnp.minimum(p * nbi + i, nblocks - 1), 0)

    kernel = _make_focal_kernel(TM, C, K, M2, nbi, gamma)

    out = pl.pallas_call(
        kernel,
        out_shape=jax.ShapeDtypeStruct((P, 8, 128), jnp.float32),
        grid_spec=pltpu.PrefetchScalarGridSpec(
            num_scalar_prefetch=0,
            grid=(P, nbi),
            in_specs=[
                pl.BlockSpec((TM, C), in_row_map),
                pl.BlockSpec((TM, K), in_row_map),
            ],
            out_specs=pl.BlockSpec((1, 8, 128), lambda p, i: (p, 0, 0)),
            scratch_shapes=[pltpu.VMEM((TM, K), jnp.float32)],
        ),
        compiler_params=pltpu.CompilerParams(
            dimension_semantics=("parallel", "arbitrary")),
    )(logits2d, tgt2d)

    # Combine the per-core partial sums and apply the mean.
    return (jnp.sum(out[:, 0, 0]) / total_count).astype(jnp.float32)


def focal_loss_ref(inputs, targets, gamma=2.0):
    """Pure-JAX reference mirroring the torch ops exactly."""
    C = inputs.shape[1]
    x = jnp.reshape(inputs, (-1, C))
    t = jnp.reshape(targets, (-1, targets.shape[1])).astype(jnp.int32)
    logpt_all = jax.nn.log_softmax(x, axis=-1)
    M2 = t.shape[0]
    logpt = jnp.take_along_axis(logpt_all[:M2], t, axis=1).reshape(-1)
    pt = jnp.exp(logpt)
    loss = -((1.0 - pt) ** gamma) * logpt
    return jnp.mean(loss)


if __name__ == "__main__":
    key = jax.random.PRNGKey(0)
    k1, k2 = jax.random.split(key)

    N, C, H, W = 2, 4, 16, 16
    inputs = jax.random.normal(k1, (N, C, H, W), dtype=jnp.float32)
    targets = jax.random.randint(k2, (N, H, W), 0, C, dtype=jnp.int32)

    loss = focal_loss_pallas(inputs, targets, gamma=2.0, reduce=True)
    loss = jax.block_until_ready(loss)

    ref = jax.block_until_ready(focal_loss_ref(inputs, targets, gamma=2.0))

    assert float(loss) >= 0.0, "Focal loss is negative."
    assert jnp.allclose(loss, ref, rtol=1e-5, atol=1e-6), (float(loss), float(ref))
    print("KERNEL_OK")
</pallas_src>

<mosaic_0001>
module attributes {stable_mosaic.version = 11 : i64} {
  func.func @kernel(%arg0: i32, %arg1: i32, %arg2: memref<32x4xf32, #tpu.memory_space<vmem>>, %arg3: memref<32x16xi32, #tpu.memory_space<vmem>>, %arg4: memref<1x8x128xf32, #tpu.memory_space<vmem>>, %arg5: memref<32x16xf32, #tpu.memory_space<vmem>>) attributes {dimension_semantics = [#tpu.dimension_semantics<parallel>, #tpu.dimension_semantics<arbitrary>], iteration_bounds = array<i64: 2, 1>, scalar_prefetch = 0 : i64, scratch_operands = 1 : i64, tpu.core_type = #tpu.core_type<tc>, window_params = [{transform_indices = @transform_0, window_bounds = array<i64: 32, 4>}, {transform_indices = @transform_1, window_bounds = array<i64: 32, 16>}, {transform_indices = @transform_2, window_bounds = array<i64: 1, 8, 128>}]} {
    %c0_i32 = arith.constant 0 : i32
    %0 = arith.cmpi eq, %arg1, %c0_i32 : i32
    %1 = arith.extui %0 : i1 to i32
    %c0_i32_0 = arith.constant 0 : i32
    %2 = arith.cmpi ne, %1, %c0_i32_0 : i32
    scf.if %2 {
      %cst_22 = arith.constant 0.000000e+00 : f32
      %74 = vector.broadcast %cst_22 : f32 to vector<32x16xf32>
      %c0_23 = arith.constant 0 : index
      %c0_24 = arith.constant 0 : index
      %75 = vector.load %arg5[%c0_23, %c0_24] : memref<32x16xf32, #tpu.memory_space<vmem>>, vector<32x16xf32>
      tpu.vector_store %arg5[%c0_23, %c0_24], %74 {strides = array<i32>} : memref<32x16xf32, #tpu.memory_space<vmem>>, vector<32x16xf32>,
    } else {
    }
    %c0 = arith.constant 0 : index
    %c0_1 = arith.constant 0 : index
    %3 = vector.load %arg2[%c0, %c0_1] : memref<32x4xf32, #tpu.memory_space<vmem>>, vector<32x4xf32>
    %cst = arith.constant dense<0xFF800000> : vector<32xf32>
    %4 = vector.multi_reduction <maximumf>, %3, %cst [1] : vector<32x4xf32> to vector<32xf32>
    %5 = vector.shape_cast %4 : vector<32xf32> to vector<32x1xf32>
    %6 = vector.broadcast %5 : vector<32x1xf32> to vector<32x4xf32>
    %7 = arith.subf %3, %6 : vector<32x4xf32>
    %8 = math.exp %7 : vector<32x4xf32>
    %cst_2 = arith.constant dense<0.000000e+00> : vector<32xf32>
    %9 = vector.multi_reduction <add>, %8, %cst_2 [1] : vector<32x4xf32> to vector<32xf32>
    %10 = vector.shape_cast %9 : vector<32xf32> to vector<32x1xf32>
    %11 = math.log %10 : vector<32x1xf32>
    %12 = arith.addf %5, %11 : vector<32x1xf32>
    %c0_3 = arith.constant 0 : index
    %c0_4 = arith.constant 0 : index
    %13 = vector.load %arg3[%c0_3, %c0_4] : memref<32x16xi32, #tpu.memory_space<vmem>>, vector<32x16xi32>
    %c1_i32 = arith.constant 1 : i32
    %14 = arith.muli %arg0, %c1_i32 : i32
    %15 = arith.addi %14, %arg1 : i32
    %c32_i32 = arith.constant 32 : i32
    %16 = arith.muli %15, %c32_i32 : i32
    %17 = tpu.iota {dimensions = array<i32: 0>} : vector<32x1xi32>
    %18 = vector.broadcast %16 : i32 to vector<32x1xi32>
    %19 = arith.addi %18, %17 : vector<32x1xi32>
    %c32_i32_5 = arith.constant 32 : i32
    %20 = vector.broadcast %c32_i32_5 : i32 to vector<32x1xi32>
    %21 = arith.cmpi slt, %19, %20 : vector<32x1xi32>
    %cst_6 = arith.constant 0.000000e+00 : f32
    %22 = vector.broadcast %cst_6 : f32 to vector<32x16xf32>
    %c0_i32_7 = arith.constant 0 : i32
    %23 = vector.broadcast %c0_i32_7 : i32 to vector<32x16xi32>
    %24 = arith.cmpi eq, %13, %23 : vector<32x16xi32>
    %25 = vector.extract_strided_slice %3 {offsets = [0, 0], sizes = [32, 1], strides = [1, 1]} : vector<32x4xf32> to vector<32x1xf32>
    %cst_8 = arith.constant 0.000000e+00 : f32
    %26 = vector.shape_cast %25 : vector<32x1xf32> to vector<32x1xf32>
    %27 = vector.broadcast %26 : vector<32x1xf32> to vector<32x16xf32>
    %28 = vector.broadcast %cst_8 : f32 to vector<32x16xf32>
    %29 = arith.select %24, %27, %28 : vector<32x16xi1>, vector<32x16xf32>
    %30 = arith.addf %22, %29 : vector<32x16xf32>
    %c1_i32_9 = arith.constant 1 : i32
    %31 = vector.broadcast %c1_i32_9 : i32 to vector<32x16xi32>
    %32 = arith.cmpi eq, %13, %31 : vector<32x16xi32>
    %33 = vector.extract_strided_slice %3 {offsets = [0, 1], sizes = [32, 1], strides = [1, 1]} : vector<32x4xf32> to vector<32x1xf32>
    %cst_10 = arith.constant 0.000000e+00 : f32
    %34 = vector.shape_cast %33 : vector<32x1xf32> to vector<32x1xf32>
    %35 = vector.broadcast %34 : vector<32x1xf32> to vector<32x16xf32>
    %36 = vector.broadcast %cst_10 : f32 to vector<32x16xf32>
    %37 = arith.select %32, %35, %36 : vector<32x16xi1>, vector<32x16xf32>
    %38 = arith.addf %30, %37 : vector<32x16xf32>
    %c2_i32 = arith.constant 2 : i32
    %39 = vector.broadcast %c2_i32 : i32 to vector<32x16xi32>
    %40 = arith.cmpi eq, %13, %39 : vector<32x16xi32>
    %41 = vector.extract_strided_slice %3 {offsets = [0, 2], sizes = [32, 1], strides = [1, 1]} : vector<32x4xf32> to vector<32x1xf32>
    %cst_11 = arith.constant 0.000000e+00 : f32
    %42 = vector.shape_cast %41 : vector<32x1xf32> to vector<32x1xf32>
    %43 = vector.broadcast %42 : vector<32x1xf32> to vector<32x16xf32>
    %44 = vector.broadcast %cst_11 : f32 to vector<32x16xf32>
    %45 = arith.select %40, %43, %44 : vector<32x16xi1>, vector<32x16xf32>
    %46 = arith.addf %38, %45 : vector<32x16xf32>
    %c3_i32 = arith.constant 3 : i32
    %47 = vector.broadcast %c3_i32 : i32 to vector<32x16xi32>
    %48 = arith.cmpi eq, %13, %47 : vector<32x16xi32>
    %49 = vector.extract_strided_slice %3 {offsets = [0, 3], sizes = [32, 1], strides = [1, 1]} : vector<32x4xf32> to vector<32x1xf32>
    %cst_12 = arith.constant 0.000000e+00 : f32
    %50 = vector.shape_cast %49 : vector<32x1xf32> to vector<32x1xf32>
    %51 = vector.broadcast %50 : vector<32x1xf32> to vector<32x16xf32>
    %52 = vector.broadcast %cst_12 : f32 to vector<32x16xf32>
    %53 = arith.select %48, %51, %52 : vector<32x16xi1>, vector<32x16xf32>
    %54 = arith.addf %46, %53 : vector<32x16xf32>
    %55 = vector.broadcast %12 : vector<32x1xf32> to vector<32x16xf32>
    %56 = arith.subf %54, %55 : vector<32x16xf32>
    %57 = math.exp %56 : vector<32x16xf32>
    %cst_13 = arith.constant 1.000000e+00 : f32
    %58 = vector.broadcast %cst_13 : f32 to vector<32x16xf32>
    %59 = arith.subf %58, %57 : vector<32x16xf32>
    %60 = arith.mulf %59, %59 : vector<32x16xf32>
    %cst_14 = arith.constant 0.000000e+00 : f32
    %61 = vector.broadcast %cst_14 : f32 to vector<32x16xf32>
    %62 = arith.subf %61, %60 : vector<32x16xf32>
    %63 = arith.mulf %62, %56 : vector<32x16xf32>
    %c0_15 = arith.constant 0 : index
    %c0_16 = arith.constant 0 : index
    %64 = vector.load %arg5[%c0_15, %c0_16] : memref<32x16xf32, #tpu.memory_space<vmem>>, vector<32x16xf32>
    %cst_17 = arith.constant 0.000000e+00 : f32
    %65 = vector.shape_cast %21 : vector<32x1xi1> to vector<32x1xi1>
    %66 = vector.broadcast %65 : vector<32x1xi1> to vector<32x16xi1>
    %67 = vector.broadcast %cst_17 : f32 to vector<32x16xf32>
    %68 = arith.select %66, %63, %67 : vector<32x16xi1>, vector<32x16xf32>
    %69 = arith.addf %64, %68 : vector<32x16xf32>
    %c0_18 = arith.constant 0 : index
    %c0_19 = arith.constant 0 : index
    %70 = vector.load %arg5[%c0_18, %c0_19] : memref<32x16xf32, #tpu.memory_space<vmem>>, vector<32x16xf32>
    tpu.vector_store %arg5[%c0_18, %c0_19], %69 {strides = array<i32>} : memref<32x16xf32, #tpu.memory_space<vmem>>, vector<32x16xf32>,
    %c0_i32_20 = arith.constant 0 : i32
    %71 = arith.cmpi eq, %arg1, %c0_i32_20 : i32
    %72 = arith.extui %71 : i1 to i32
    %c0_i32_21 = arith.constant 0 : i32
    %73 = arith.cmpi ne, %72, %c0_i32_21 : i32
    scf.if %73 {
      %c0_22 = arith.constant 0 : index
      %c0_23 = arith.constant 0 : index
      %74 = vector.load %arg5[%c0_22, %c0_23] : memref<32x16xf32, #tpu.memory_space<vmem>>, vector<32x16xf32>
      %75 = vector.shape_cast %74 : vector<32x16xf32> to vector<1x32x16xf32>
      %cst_24 = arith.constant dense<0.000000e+00> : vector<1xf32>
      %76 = vector.multi_reduction <add>, %75, %cst_24 [1, 2] : vector<1x32x16xf32> to vector<1xf32>
      %77 = vector.shape_cast %76 : vector<1xf32> to vector<1x1x1xf32>
      %78 = vector.extract %77[0, 0, 0] : f32 from vector<1x1x1xf32>
      %79 = vector.broadcast %78 : f32 to vector<1x8x128xf32>
      %c0_25 = arith.constant 0 : index
      %c0_26 = arith.constant 0 : index
      %c0_27 = arith.constant 0 : index
      %80 = vector.load %arg4[%c0_25, %c0_26, %c0_27] : memref<1x8x128xf32, #tpu.memory_space<vmem>>, vector<1x8x128xf32>
      tpu.vector_store %arg4[%c0_25, %c0_26, %c0_27], %79 {strides = array<i32>} : memref<1x8x128xf32, #tpu.memory_space<vmem>>, vector<1x8x128xf32>,
    } else {
    }
    return
  }
  func.func @transform_0(%arg0: i32, %arg1: i32) -> (i32, i32) {
    %c1_i32 = arith.constant 1 : i32
    %0 = arith.muli %arg0, %c1_i32 : i32
    %1 = arith.addi %0, %arg1 : i32
    %c0_i32 = arith.constant 0 : i32
    %2 = arith.minsi %1, %c0_i32 : i32
    %c0_i32_0 = arith.constant 0 : i32
    %c0_i32_1 = arith.constant 0 : i32
    return %2, %c0_i32_0 : i32, i32
  }
  func.func @transform_1(%arg0: i32, %arg1: i32) -> (i32, i32) {
    %c1_i32 = arith.constant 1 : i32
    %0 = arith.muli %arg0, %c1_i32 : i32
    %1 = arith.addi %0, %arg1 : i32
    %c0_i32 = arith.constant 0 : i32
    %2 = arith.minsi %1, %c0_i32 : i32
    %c0_i32_0 = arith.constant 0 : i32
    %c0_i32_1 = arith.constant 0 : i32
    return %2, %c0_i32_0 : i32, i32
  }
  func.func @transform_2(%arg0: i32, %arg1: i32) -> (i32, i32, i32) {
    %c0_i32 = arith.constant 0 : i32
    %c0_i32_0 = arith.constant 0 : i32
    %c0_i32_1 = arith.constant 0 : i32
    return %arg0, %c0_i32, %c0_i32_0 : i32, i32, i32
  }
}

</mosaic_0001>

<bundles_post_ra>
// kernel: tpu_custom_call.1
= control target key start
LH: loop header
LB: loop body
LE: loop exit
PB: predicated region body
PF: predicated region fallthrough
CT: control target
= control target key end

     0   :  { %7 = vsyncpa [#allocation4], 0  ;;  %s979_s0 = inlined_call_operand.vmem [shape: f32[512,4], index: 0, kind: input, shape index: {}]   ;;  %s980_s1 = inlined_call_operand.vmem [shape: s32[32,16], index: 1, kind: input, shape index: {}]   ;;  %s981_s2 = inlined_call_operand.hbm [shape: f32[2,8,128], index: 2, kind: output, shape index: {}]  }
   0x1   :  { %9 = vsyncpa [#allocation4 + $0x1], 0  ;;  %s804_s9 = smov 0   ;;  %s806_s10 = smov 0  }
   0x2   :  { %s808_s11 = smov 0   ;;  %s810_s12 = smov 0  }
   0x3   :  { %s812_s13 = smov 0   ;;  %s814_s14 = smov 0  }
   0x4 LB: > { %s589_s15 = sadd.s32 4294967295, %s781_s14   ;;  %s590_s16 = sadd.s32 4294967294, %s781_s14   ;;  %s781_s14 = sphi %s814_s14, %s15_s14   ;;  %s777_s13 = sphi %s812_s13, %s988_s13   ;;  %s773_s12 = sphi %s810_s12, %s987_s12   ;;  %s769_s11 = sphi %s808_s11, %s986_s11   ;;  %s765_s10 = sphi %s806_s10, %s985_s10   ;;  %s761_s9 = sphi %s804_s9, %s984_s9  }
   0x5   : > { %s27_s17 = sadd.s32 1, %s777_s13  ;;  %s98_s18 = sadd.s32 1, %s769_s11 }
   0x6   : > { %p29_p0 = scmp.ge.s32.totalorder %s27_s17, 2  ;;  %p108_p1 = scmp.ne.s32.totalorder %s769_s11, %s765_s10 }
   0x7   : > { %p109_p2 = scmp.eq.s32.totalorder %s589_s15, 1  ;;  %p114_p3 = scmp.ne.s32.totalorder %s765_s10, %s761_s9 }
   0x8   : > { %s990_s17 = smov (%p29_p0, %s27_s17), 0  ;;  %p115_p5 = scmp.eq.s32.totalorder %s590_s16, 1 }
   0x9   : > { %p844_p4 = por %p109_p2, %p108_p1  ;;  %s95_s20 = ssub.s32 %s777_s13, %s990_s17 }
   0xa   : > { %p593_p6 = scmp.ge.s32.totalorder %s781_s14, 1  ;;  %p96_p7 = scmp.eq.s32.totalorder %s95_s20, 0 }
   0xb   : > { %p851_p8 = por %p115_p5, %p114_p3  ;;  %p163_p9 = scmp.lt.s32.totalorder %s781_s14, 3 }
   0xc   : > { %s857_s22 = scalar_select %p96_p7, %s769_s11, %s98_s18  }
   0xd   : > { %p164_p10 = pnand %p593_p6, %p163_p9 }
   0xe   : > { %p197_p11 = scmp.lt.s32.totalorder (!%p164_p10), %s773_s12, 0  ;;  %v783_v0 = vmov (!%p164_p10), 0   ;;  %vm233_vm0 = vcmask (!%p164_p10), 31744   ;;  %v784_v9 = vmov (!%p164_p10), 1   ;;  %v785_v10 = vmov (!%p164_p10), 3   ;;  %s599_s6 = sshll.u32 (!%p164_p10), %s773_s12, 5 }
   0xf   : > { %167 = sbr.rel (%p164_p10) target bundleno = 612 (0x264), region = 28  ;;  %667 = vset.pattern.permute.xlu1 (!%p164_p10), %v783_v0  ;;  %666 = vset.pattern.permute.xlu0 (!%p164_p10), %v783_v0  ;;  %v786_v11 = vmov (!%p164_p10), 2   ;;  %vm224_vm1 = vcmask (!%p164_p10), 130048   ;;  %v787_v12 = vmov (!%p164_p10), 0.0   ;;  %s193_s7 = sand.u32 (!%p164_p10), 1, %s765_s10  }
  0x10   : > { %225 = vst.msk [vmem:[#allocation2] sm:$0xff] (!%p164_p10), %vm224_vm1, %v787_v12  ;;  %226 = vst.msk [vmem:[#allocation2 + $0x8] sm:$0xff] (!%p164_p10), %vm224_vm1, %v787_v12  ;;  %s594_s8 = sshll.u32 (!%p164_p10), %s193_s7, 3  ;;  %s601_s18 = sshll.u32 (!%p164_p10), %s773_s12, 7 }
  0x11   : > { %227 = vst.msk [vmem:[#allocation2 + $0x10] sm:$0xff] (!%p164_p10), %vm224_vm1, %v787_v12  ;;  %228 = vst.msk [vmem:[#allocation2 + $0x18] sm:$0xff] (!%p164_p10), %vm224_vm1, %v787_v12  ;;  %s195_s15 = scalar_lea.vmem (!%p164_p10), [#allocation3], %s594_s8 }
  0x12   : > { %s510_s16 = sshll.u32 (!%p164_p10), %s195_s15, 4  ;;  %s929_s16 = int_to_ptr.vmem [resolvable:$true] %s510_s16 }
  0x13   : > { %s703_s27 = scalar_lea.vmem (!%p164_p10), %s929_s16, 128 }
  0x14   : > { %p704_p0 = scmp.ne.s32.totalorder (!%p164_p10), %s929_s16, %s703_s27 }
  0x16   : > { %s198_s23 = scalar_select %p197_p11, %s773_s12, 0 }
  0x17   : > { %p705_p1 = pnand %p704_p0, %p844_p4  ;;  %s788_s12 = smov [#allocation3]  }
  0x18   : > { %s861_s24 = sshll.u32 %s198_s23, 2  ;;  %s707_s28 = sshll.u32 %s788_s12, 4  ;;  %s708_s28 = int_to_ptr.vmem [resolvable:$false] %s707_s28 }
  0x19   : > { %p200_p12 = scmp.lt.s32.totalorder %s861_s24, 63  ;;  %p212_p13 = scmp.lt.s32.totalorder %s861_s24, 3 }
  0x1a   : > { %p706_p2 = pneg %p705_p1  ;;  %p710_p3 = scmp.lt.s32.totalorder %s929_s16, %s708_s28 }
  0x1b   : > { %s201_s25 = scalar_select %p200_p12, %s861_s24, 63 }
  0x1c   : > { %s992_s24 = smov (!%p212_p13, %s861_s24), 3 }
  0x1d   : > { %s596_s26 = sshll.u32 %s201_s25, 3  ;;  %s598_s30 = sshll.u32 %s992_s24, 3 }
  0x1e   : > { %s203_s29 = scalar_lea.vmem %s979_s0, %s596_s26  ;;  %s215_s5 = scalar_lea.vmem %s980_s1, %s598_s30 }
  0x1f   : > { %v229_v1 = vld [vmem:[%s203_s29] sm:$0xff]  ;;  %v868_v2 = vld [vmem:[%s203_s29 + $0x10] sm:$0xff]  ;;  %v230_v3 = vld [vmem:[%s203_s29 + $0x8] sm:$0xff]  ;;  %s934_s25 = scalar_lea.hbm %s981_s2, %s601_s18  ;;  %s497_s26 = scalar_lea.sflag [#allocation4], %s193_s7 }
  0x20   : > { %v234_v4 = vsel %vm233_vm0, %v229_v1, -inf  ;;  %v240_v5 = vsel %vm233_vm0, %v868_v2, -inf  ;;  %v873_v6 = vld [vmem:[%s203_s29 + $0x18] sm:$0xff]  ;;  %v237_v7 = vsel %vm233_vm0, %v230_v3, -inf  ;;  %v282_v46 = vld [vmem:[%s215_s5] sm:$0xff]  ;;  %v283_v49 = vld [vmem:[%s215_s5 + $0x8] sm:$0xff] }
  0x21   : > { %235 = vmax.xlane.f32.xlu0 %v234_v4  ;;  %241 = vmax.xlane.f32.xlu1 %v240_v5  ;;  %v243_v8 = vsel %vm233_vm0, %v873_v6, -inf  ;;  %vm334_vm2 = vcmp.eq.s32.totalorder %v282_v46, 1  ;;  %vm302_vm3 = vcmp.eq.s32.totalorder %v282_v46, 0  ;;  %v284_v51 = vld [vmem:[%s215_s5 + $0x10] sm:$0xff]  ;;  %vm303_vm4 = vcmp.eq.s32.totalorder %v283_v49, 0  ;;  %v285_v56 = vld [vmem:[%s215_s5 + $0x18] sm:$0xff] }
  0x22   : > { %vm335_vm5 = vcmp.eq.s32.totalorder %v283_v49, 1  ;;  %vm362_vm6 = vcmp.eq.s32.totalorder %v282_v46, 2  ;;  %vm304_vm7 = vcmp.eq.s32.totalorder %v284_v51, 0  ;;  %vm336_vm8 = vcmp.eq.s32.totalorder %v284_v51, 1  ;;  %s709_s29 = scalar_lea.vmem %s708_s28, 256 }
  0x23   : > { %vm363_vm9 = vcmp.eq.s32.totalorder %v283_v49, 2  ;;  %vm390_vm10 = vcmp.eq.s32.totalorder %v282_v46, 3  ;;  %vm337_vm11 = vcmp.eq.s32.totalorder %v285_v56, 1  ;;  %vm305_vm12 = vcmp.eq.s32.totalorder %v285_v56, 0  ;;  %p711_p5 = scmp.lt.s32.totalorder %s709_s29, %s703_s27 }
  0x24   : > { %vm364_vm13 = vcmp.eq.s32.totalorder %v284_v51, 2  ;;  %vm391_vm14 = vcmp.eq.s32.totalorder %v283_v49, 3  ;;  %vm365_vm15 = vcmp.eq.s32.totalorder %v285_v56, 2 }
  0x25   : > { %238 = vmax.xlane.f32.xlu0 %v237_v7  ;;  %244 = vmax.xlane.f32.xlu1 %v243_v8  ;;  %p712_p6 = por %p711_p5, %p710_p3 }
  0x27   : > { %p713_p7 = pnand %p712_p6, %p706_p2 }
  0x36   : > { %313 = vperm.xlu1 %667, %v230_v3  }
  0x3a   : > { %668 = vset.pattern.permute.xlu1 %v784_v9 }
  0x3b   : > { %339 = vperm.xlu1 %668, %v229_v1   ;;  %308 = vperm.xlu0 %666, %v229_v1  }
  0x3f   : > { %343 = vperm.xlu1 %668, %v230_v3   ;;  %673 = vset.pattern.permute.xlu0 %v784_v9 }
  0x40   : > { %351 = vperm.xlu0 %673, %v873_v6  }
  0x43   : > { %669 = vset.pattern.permute.xlu1 %v783_v0 }
  0x44   : > { %318 = vperm.xlu1 %669, %v868_v2   ;;  %676 = vset.pattern.permute.xlu0 %v785_v10 }
  0x45   : > { %399 = vperm.xlu0 %676, %v230_v3  }
  0x48   : > { %670 = vset.pattern.permute.xlu1 %v784_v9 }
  0x49   : > { %347 = vperm.xlu1 %670, %v868_v2  }
  0x4d   : > { %671 = vset.pattern.permute.xlu1 %v786_v11 }
  0x4e   : > { %367 = vperm.xlu1 %671, %v229_v1  }
  0x52   : > { %371 = vperm.xlu1 %671, %v230_v3  }
  0x56   : > { %672 = vset.pattern.permute.xlu1 %v783_v0 }
  0x57   : > { %323 = vperm.xlu1 %672, %v873_v6  }
  0x5b   : > { %674 = vset.pattern.permute.xlu1 %v786_v11 }
  0x5c   : > { %375 = vperm.xlu1 %674, %v868_v2  }
  0x60   : > { %675 = vset.pattern.permute.xlu1 %v785_v10 }
  0x61   : > { %395 = vperm.xlu1 %675, %v229_v1  }
  0x65   : > { %677 = vset.pattern.permute.xlu1 %v786_v11 }
  0x66   : > { %379 = vperm.xlu1 %677, %v873_v6  }
  0x6a   : > { %678 = vset.pattern.permute.xlu1 %v785_v10 }
  0xae   : > { %v888_v13 = vpop.xlane.xlu0 %235  ;;  %v890_v14 = vpop.xlane.xlu1 %241 }
  0xaf   : > { %v246_v15 = vsub.f32 %v229_v1, %v888_v13  ;;  %v248_v16 = vsub.f32 %v868_v2, %v890_v14 }
  0xb1   : > { %v250_v17 = vmul.f32 1.442695, %v246_v15  ;;  %v254_v18 = vmul.f32 1.442695, %v248_v16 }
  0xb2   : > { %v895_v19 = vpop.xlane.xlu0 %238  ;;  %v897_v20 = vpop.xlane.xlu1 %244 }
  0xb3   : > { %679 = vpow2.f32 %v250_v17  ;;  %v247_v21 = vsub.f32 %v230_v3, %v895_v19  ;;  %v249_v22 = vsub.f32 %v873_v6, %v897_v20 }
  0xb4   : > { %681 = vpow2.f32 %v254_v18 }
  0xb5   : > { %v252_v23 = vmul.f32 1.442695, %v247_v21  ;;  %v256_v24 = vmul.f32 1.442695, %v249_v22 }
  0xb6   : > { %v314_v33 = vpop.permute.xlu1 %313 }
  0xb7   : > { %683 = vpow2.f32 %v252_v23  ;;  %v327_v57 = vsel %vm303_vm4, %v314_v33, 0.0 }
  0xb8   : > { %685 = vpow2.f32 %v256_v24 }
  0xba   : > { %v340_v34 = vpop.permute.xlu1 %339  ;;  %v309_v40 = vpop.permute.xlu0 %308 }
  0xbb   : > { %v354_v50 = vsel %vm334_vm2, %v340_v34, 0.0  ;;  %v326_v52 = vsel %vm302_vm3, %v309_v40, 0.0  ;;  %vm393_vm2 = vcmp.eq.s32.totalorder %v285_v56, 3 }
  0xbc   : > { %v358_v55 = vadd.f32 %v354_v50, %v326_v52 }
  0xbd   : > { %v680_v25 = vpop.eup %679 }
  0xbe   : > { %v682_v26 = vpop.eup %681  ;;  %v258_v27 = vsel %vm233_vm0, %v680_v25, 0.0  ;;  %v344_v35 = vpop.permute.xlu1 %343 }
  0xbf   : > { %259 = vadd.xlane.f32.xlu0 %v258_v27  ;;  %v264_v28 = vsel %vm233_vm0, %v682_v26, 0.0  ;;  %v352_v42 = vpop.permute.xlu0 %351  ;;  %v355_v58 = vsel %vm335_vm5, %v344_v35, 0.0 }
  0xc0   : > { %v359_v61 = vadd.f32 %v355_v58, %v327_v57  ;;  %v357_v4 = vsel %vm337_vm11, %v352_v42, 0.0  ;;  %v288_v42 = vlaneseq  ;;  %v446_v57 = vld [vmem:[#allocation2] sm:$0xff] }
  0xc1   : > { %v684_v29 = vpop.eup %683 }
  0xc2   : > { %v686_v30 = vpop.eup %685  ;;  %v261_v31 = vsel %vm233_vm0, %v684_v29, 0.0 }
  0xc3   : > { %265 = vadd.xlane.f32.xlu0 %v264_v28  ;;  %262 = vadd.xlane.f32.xlu1 %v261_v31  ;;  %v267_v32 = vsel %vm233_vm0, %v686_v30, 0.0  ;;  %v319_v36 = vpop.permute.xlu1 %318  ;;  %vm392_vm0 = vcmp.eq.s32.totalorder %v284_v51, 3 }
  0xc4   : > { %v400_v44 = vpop.permute.xlu0 %399  ;;  %v328_v62 = vsel %vm304_vm7, %v319_v36, 0.0 }
  0xc5   : > { %v411_v17 = vsel %vm391_vm14, %v400_v44, 0.0  ;;  %v293_v44 = vstv %s599_s6 }
  0xc7   : > { %268 = vadd.xlane.f32.xlu1 %v267_v32 }
  0xc8   : > { %v348_v37 = vpop.permute.xlu1 %347 }
  0xc9   : > { %v356_v63 = vsel %vm336_vm8, %v348_v37, 0.0 }
  0xca   : > { %v360_v7 = vadd.f32 %v356_v63, %v328_v62 }
  0xcd   : > { %v368_v38 = vpop.permute.xlu1 %367 }
  0xce   : > { %v382_v59 = vsel %vm362_vm6, %v368_v38, 0.0 }
  0xcf   : > { %v386_v0 = vadd.f32 %v382_v59, %v358_v55 }
  0xd1   : > { %v372_v39 = vpop.permute.xlu1 %371 }
  0xd6   : > { %v324_v41 = vpop.permute.xlu1 %323 }
  0xd7   : > { %v329_v5 = vsel %vm305_vm12, %v324_v41, 0.0 }
  0xd8   : > { %403 = vperm.xlu1 %678, %v868_v2   ;;  %v383_v2 = vsel %vm363_vm9, %v372_v39, 0.0  ;;  %v361_v16 = vadd.f32 %v357_v4, %v329_v5  ;;  %v447_v5 = vld [vmem:[#allocation2 + $0x8] sm:$0xff] }
  0xd9   : > { %407 = vperm.xlu0 %676, %v873_v6   ;;  %v387_v9 = vadd.f32 %v383_v2, %v359_v61 }
  0xdb   : > { %v376_v43 = vpop.permute.xlu1 %375  ;;  %v415_v28 = vadd.f32 %v411_v17, %v387_v9  ;;  %v449_v17 = vld [vmem:[#allocation2 + $0x18] sm:$0xff] }
  0xdc   : > { %v384_v10 = vsel %vm364_vm13, %v376_v43, 0.0 }
  0xdd   : > { %v388_v25 = vadd.f32 %v384_v10, %v360_v7 }
  0xe0   : > { %v396_v45 = vpop.permute.xlu1 %395 }
  0xe1   : > { %v410_v3 = vsel %vm390_vm10, %v396_v45, 0.0 }
  0xe2   : > { %v414_v11 = vadd.f32 %v410_v3, %v386_v0 }
  0xe5   : > { %v380_v47 = vpop.permute.xlu1 %379 }
  0xe6   : > { %v385_v26 = vsel %vm365_vm15, %v380_v47, 0.0 }
  0xe7   : > { %v389_v34 = vadd.f32 %v385_v26, %v361_v16 }
 0x14c   : > { %v260_v48 = vpop.xlane.xlu0 %259 }
 0x14d   : > { %687 = vlog2.f32 %v260_v48 }
 0x150   : > { %v263_v53 = vpop.xlane.xlu1 %262  ;;  %v266_v54 = vpop.xlane.xlu0 %265 }
 0x151   : > { %689 = vlog2.f32 %v263_v53 }
 0x152   : > { %691 = vlog2.f32 %v266_v54 }
 0x154   : > { %v269_v60 = vpop.xlane.xlu1 %268 }
 0x155   : > { %693 = vlog2.f32 %v269_v60 }
 0x157   : > { %v688_v1 = vpop.eup %687 }
 0x158   : > { %v271_v6 = vmul.f32 0.6931472, %v688_v1  ;;  %v404_v8 = vpop.permute.xlu1 %403  ;;  %v408_v24 = vpop.permute.xlu0 %407 }
 0x159   : > { %v412_v23 = vsel %vm392_vm0, %v404_v8, 0.0  ;;  %v413_v33 = vsel %vm393_vm2, %v408_v24, 0.0  ;;  %v448_v8 = vld [vmem:[#allocation2 + $0x10] sm:$0xff] }
 0x15a   : > { %v278_v12 = vadd.f32 %v271_v6, %v888_v13  ;;  %v416_v32 = vadd.f32 %v412_v23, %v388_v25  ;;  %v417_v40 = vadd.f32 %v413_v33, %v389_v34 }
 0x15b   : > { %v690_v15 = vpop.eup %689 }
 0x15c   : > { %v692_v18 = vpop.eup %691  ;;  %v418_v21 = vsub.f32 %v414_v11, %v278_v12  ;;  %v273_v22 = vmul.f32 0.6931472, %v690_v15 }
 0x15d   : > { %v275_v27 = vmul.f32 0.6931472, %v692_v18 }
 0x15e   : > { %v422_v29 = vmul.f32 1.442695, %v418_v21  ;;  %v279_v30 = vadd.f32 %v273_v22, %v895_v19 }
 0x15f   : > { %v694_v31 = vpop.eup %693  ;;  %v280_v13 = vadd.f32 %v275_v27, %v890_v14  ;;  %v289_v14 = vshrl.u32 %v288_v42, 7 }
 0x160   : > { %695 = vpow2.f32 %v422_v29  ;;  %v419_v35 = vsub.f32 %v415_v28, %v279_v30  ;;  %v277_v36 = vmul.f32 0.6931472, %v694_v31 }
 0x161   : > { %v420_v37 = vsub.f32 %v416_v32, %v280_v13  ;;  %v294_v47 = vadd.s32 %v293_v44, %v289_v14  ;;  %v290_v48 = vadd.s32 8, %v289_v14  ;;  %v291_v50 = vadd.s32 16, %v289_v14 }
 0x162   : > { %v424_v38 = vmul.f32 1.442695, %v419_v35  ;;  %v281_v39 = vadd.f32 %v277_v36, %v897_v20  ;;  %v292_v56 = vadd.s32 24, %v289_v14 }
 0x163   : > { %v426_v41 = vmul.f32 1.442695, %v420_v37  ;;  %vm298_vm3 = vcmp.lt.s32.totalorder %v294_v47, 32  ;;  %v295_v54 = vadd.s32 %v293_v44, %v290_v48  ;;  %v296_v60 = vadd.s32 %v293_v44, %v291_v50 }
 0x164   : > { %697 = vpow2.f32 %v424_v38  ;;  %v421_v43 = vsub.f32 %v417_v40, %v281_v39  ;;  %v297_v4 = vadd.s32 %v293_v44, %v292_v56 }
 0x165   : > { %699 = vpow2.f32 %v426_v41  ;;  %vm299_vm4 = vcmp.lt.s32.totalorder %v295_v54, 32  ;;  %vm300_vm5 = vcmp.lt.s32.totalorder %v296_v60, 32 }
 0x166   : > { %v428_v19 = vmul.f32 1.442695, %v421_v43  ;;  %vm301_vm6 = vcmp.lt.s32.totalorder %v297_v4, 32 }
 0x168   : > { %701 = vpow2.f32 %v428_v19 }
 0x16a   : > { %v696_v45 = vpop.eup %695 }
 0x16b   : > { %v430_v46 = vsub.f32 1.0, %v696_v45 }
 0x16d   : > { %v434_v49 = vmul.f32 %v430_v46, %v430_v46 }
 0x16e   : > { %v698_v51 = vpop.eup %697 }
 0x16f   : > { %v700_v52 = vpop.eup %699  ;;  %v438_v20 = vsub.f32 0.0, %v434_v49  ;;  %v431_v53 = vsub.f32 1.0, %v698_v51 }
 0x170   : > { %v432_v55 = vsub.f32 1.0, %v700_v52 }
 0x171   : > { %v442_v58 = vmul.f32 %v438_v20, %v418_v21  ;;  %v435_v59 = vmul.f32 %v431_v53, %v431_v53 }
 0x172   : > { %v702_v61 = vpop.eup %701  ;;  %v436_v62 = vmul.f32 %v432_v55, %v432_v55 }
 0x173   : > { %v458_v63 = vsel %vm298_vm3, %v442_v58, 0.0  ;;  %v439_v0 = vsub.f32 0.0, %v435_v59  ;;  %v433_v1 = vsub.f32 1.0, %v702_v61 }
 0x174   : > { %v462_v2 = vadd.f32 %v458_v63, %v446_v57  ;;  %v440_v3 = vsub.f32 0.0, %v436_v62 }
 0x175   : > { %v443_v6 = vmul.f32 %v439_v0, %v419_v35  ;;  %v437_v7 = vmul.f32 %v433_v1, %v433_v1 }
 0x176   : > { %467 = vst.msk [vmem:[#allocation2] sm:$0xff] %vm224_vm1, %v462_v2  ;;  %v444_v9 = vmul.f32 %v440_v3, %v420_v37 }
 0x177   : > { %v459_v10 = vsel %vm299_vm4, %v443_v6, 0.0  ;;  %v441_v11 = vsub.f32 0.0, %v437_v7 }
 0x178   : > { %v463_v12 = vadd.f32 %v459_v10, %v447_v5  ;;  %v460_v15 = vsel %vm300_vm5, %v444_v9, 0.0 }
 0x179   : > { %v464_v16 = vadd.f32 %v460_v15, %v448_v8  ;;  %v445_v18 = vmul.f32 %v441_v11, %v421_v43 }
 0x17a   : > { %468 = vst.msk [vmem:[#allocation2 + $0x8] sm:$0xff] %vm224_vm1, %v463_v12 }
 0x17b   : > { %469 = vst.msk [vmem:[#allocation2 + $0x10] sm:$0xff] %vm224_vm1, %v464_v16  ;;  %v461_v21 = vsel %vm301_vm6, %v445_v18, 0.0 }
 0x17c   : > { %v465_v22 = vadd.f32 %v461_v21, %v449_v17 }
 0x17d   : > { %v474_v23 = vld [vmem:[#allocation2] sm:$0xff] }
 0x17e   : > { %470 = vst.msk [vmem:[#allocation2 + $0x18] sm:$0xff] %vm224_vm1, %v465_v22  ;;  %v478_v26 = vsel %vm224_vm1, %v474_v23, 0.0 }
 0x181   : > { %v475_v24 = vld [vmem:[#allocation2 + $0x8] sm:$0xff] }
 0x182   : > { %v476_v25 = vld [vmem:[#allocation2 + $0x10] sm:$0xff]  ;;  %v479_v27 = vsel %vm224_vm1, %v475_v24, 0.0 }
 0x183   : > { %v480_v28 = vadd.f32 %v479_v27, %v478_v26  ;;  %v481_v29 = vsel %vm224_vm1, %v476_v25, 0.0 }
 0x185   : > { %v477_v30 = vld [vmem:[#allocation2 + $0x18] sm:$0xff]  ;;  %v482_v31 = vadd.f32 %v481_v29, %v480_v28 }
 0x186   : > { %v483_v13 = vsel %vm224_vm1, %v477_v30, 0.0 }
 0x187   : > { %v484_v32 = vadd.f32 %v483_v13, %v482_v31 }
 0x189   : > { %485 = vadd.xlane.f32.xlu1 %v484_v32 }
 0x216   : > { %v486_v33 = vpop.xlane.xlu1 %485 }
 0x217   : > { %v487_v34 = vrot.slane %v486_v33, 4 }
 0x219   : > { %v488_v35 = vadd.f32 %v487_v34, %v486_v33 }
 0x21b   : > { %v489_v36 = vrot.slane %v488_v35, 2 }
 0x21d   : > { %v490_v37 = vadd.f32 %v489_v36, %v488_v35 }
 0x21f   : > { %v491_v38 = vrot.slane %v490_v37, 1 }
 0x221   : > { %v492_v39 = vadd.f32 %v491_v38, %v490_v37 }
 0x223   : > { %604 = vpush %v492_v39 }
 0x254   : > { %s605_s20 = spop %604 }
 0x255   : > { %v494_v40 = vstv %s605_s20 }
 0x256   : > { %495 = vst [vmem:[%s195_s15] sm:$0xff] %v494_v40 }
 0x257   : > { %716 = shalt.err (!%p713_p7)
}
 0x258   : > { %s717_s30 = scalar_lea.hbm %s934_s25, 128  ;;  %s721_s5 = scalar_lea.hbm %s981_s2, 256 }
 0x259   : > { %p718_p9 = scmp.ne.s32.totalorder %s934_s25, %s717_s30  ;;  %p722_p12 = scmp.lt.u32.totalorder %s934_s25, %s981_s2 }
 0x25a   : > { %p723_p13 = scmp.lt.u32.totalorder %s721_s5, %s717_s30  ;;  %p725_p1 = scmp.lt.u32.totalorder %s717_s30, %s934_s25 }
 0x25b   : > { %p719_p10 = pnand %p718_p9, %p844_p4 }
 0x25c   : > { %p724_p0 = por %p723_p13, %p722_p12 }
 0x25d   : > { %p720_p11 = pneg %p719_p10 }
 0x25e   : > { %p726_p2 = por %p725_p1, %p724_p0 }
 0x260   : > { %p727_p3 = pnand %p726_p2, %p720_p11 }
 0x262   : > { %730 = shalt.err (!%p727_p3)
}
 0x263   : > { %606 = dma.vmem_to_hbm [thread:$0]  (%p844_p4), %s929_s16, 128, %s934_s25, %s497_s26  }
 0x264 PF: > { %p612_p5 = scmp.ge.s32.totalorder %s781_s14, 2  ;;  %s522_s8 = sand.u32 1, %s761_s9  }
 0x265   : > { %s523_s15 = scalar_lea.sflag [#allocation4], %s522_s8 }
 0x266   : > { %p609_p6 = pnand %p612_p5, %p851_p8 }
 0x268   : > { %756 = dma.done.wait (!%p609_p6), %s523_s15, 128  }
 0x269   : > { %758 = vsyncadd (!%p609_p6), %s523_s15, 4294967168  ;;  %s15_s14 = sadd.s32 1, %s781_s14   ;;  %s984_s9 = smov %s765_s10 }
 0x26a   : > { %p12_p7 = scmp.ge.s32.totalorder %s15_s14, 4   ;;  %s985_s10 = smov %s769_s11 }
 0x26b   : > { %s986_s11 = smov %s857_s22  ;;  %s987_s12 = smov %s777_s13 }
 0x26c   : > { %s988_s13 = smov %s990_s17  ;;  %14 = sbr.rel (!%p12_p7) target bundleno = 4 (0x4), region = 74 }
 0x273   :  { %528 = vsyncpa [#allocation4], 1 }
 0x274   :  { %530 = vsyncpa [#allocation4 + $0x1], 1 }

</bundles_post_ra>
